<compile_context>
chip_gen: v7x
topology: tpu7x:2x2x1
jax: 0.10.0
libtpu: 0.0.40
codegen_flags: <defaults>
</compile_context>

<pallas_src>
import functools

import jax
import jax.numpy as jnp
from jax.experimental import pallas as pl
from jax.experimental.pallas import tpu as pltpu

HIDDEN = 64            # fixed by the PyTorch module
FUSED_H = 2 * HIDDEN   # 128 -> exactly one MXU lane tile
W3_LANES = 128         # fused third-layer weight width (lane-dense matmul)


def policy_kernel(x_ref, w1_ref, b1_ref, w2_ref, b2_ref, w3_ref, b3_ref,
                  mean_ref, val_ref):
    """Fused actor+critic forward for one batch tile.

    x_ref: (TB, S) f32     w1/w2/w3: bf16 (S,128)/(128,128)/(128,128)
    b1/b2/b3: f32 (1,128)  mean_ref: (TB, A) f32   val_ref: (TB, 1) f32
    """
    A = mean_ref.shape[1]
    x = x_ref[...].astype(jnp.bfloat16)           # cast in-kernel (x read once, f32)
    h = jnp.tanh(
        jnp.dot(x, w1_ref[...], preferred_element_type=jnp.float32) + b1_ref[...]
    )
    h = jnp.tanh(
        jnp.dot(h.astype(jnp.bfloat16), w2_ref[...],
                preferred_element_type=jnp.float32) + b2_ref[...]
    )
    y = jnp.dot(h.astype(jnp.bfloat16), w3_ref[...],
                preferred_element_type=jnp.float32) + b3_ref[...]
    mean_ref[...] = y[:, :A]          # actor mean lanes
    val_ref[...] = y[:, A:A + 1]      # critic value lane


def init_policy_params(key, state_space, action_space, hidden=HIDDEN):
    """Deterministic init mirroring Policy.init_weights():
    weights ~ Normal(0, 1), biases = 0, sigma param = 0.5."""
    ks = jax.random.split(key, 6)
    return {
        # actor
        "w1a": jax.random.normal(ks[0], (state_space, hidden), jnp.float32),
        "b1a": jnp.zeros((1, hidden), jnp.float32),
        "w2a": jax.random.normal(ks[1], (hidden, hidden), jnp.float32),
        "b2a": jnp.zeros((1, hidden), jnp.float32),
        "w3a": jax.random.normal(ks[2], (hidden, action_space), jnp.float32),
        "b3a": jnp.zeros((1, action_space), jnp.float32),
        "sigma": jnp.full((1, action_space), 0.5, jnp.float32),
        # critic
        "w1c": jax.random.normal(ks[3], (state_space, hidden), jnp.float32),
        "b1c": jnp.zeros((1, hidden), jnp.float32),
        "w2c": jax.random.normal(ks[4], (hidden, hidden), jnp.float32),
        "b2c": jnp.zeros((1, hidden), jnp.float32),
        "w3c": jax.random.normal(ks[5], (hidden, 1), jnp.float32),
        "b3c": jnp.zeros((1, 1), jnp.float32),
    }


def pack_policy_params(p):
    """Fuse actor+critic weights into 128-lane matrices (once, outside the
    kernel) and quantize the matmul operands to bf16. Biases stay f32."""
    H = HIDDEN
    A = p["w3a"].shape[1]
    assert A + 1 <= W3_LANES, "action_space too large for packed output"
    bf = jnp.bfloat16

    w1 = jnp.concatenate([p["w1a"], p["w1c"]], axis=1).astype(bf)     # (S, 128)
    b1 = jnp.concatenate([p["b1a"], p["b1c"]], axis=1)                # (1, 128) f32

    w2 = jnp.zeros((FUSED_H, FUSED_H), jnp.float32)
    w2 = w2.at[:H, :H].set(p["w2a"]).at[H:, H:].set(p["w2c"]).astype(bf)
    b2 = jnp.concatenate([p["b2a"], p["b2c"]], axis=1)                # (1, 128) f32

    w3 = jnp.zeros((FUSED_H, W3_LANES), jnp.float32)
    w3 = w3.at[:H, :A].set(p["w3a"]).at[H:, A:A + 1].set(p["w3c"]).astype(bf)
    b3 = jnp.zeros((1, W3_LANES), jnp.float32)
    b3 = b3.at[:, :A].set(p["b3a"]).at[:, A:A + 1].set(p["b3c"])

    return {"w1": w1, "b1": b1, "w2": w2, "b2": b2, "w3": w3, "b3": b3,
            "sigma": p["sigma"], "action_space": A}


def _round_up(n, m):
    return ((n + m - 1) // m) * m


def _choose_batch_tile(B):
    """Batch tile: big enough to amortize the ~0.35us grid-step overhead,
    but >= 2 grid steps at large B so both v7x TensorCores get work."""
    if B <= 1024:
        return _round_up(max(B, 8), 8)           # single grid step
    return min(2048, _round_up(-(-B // 2), 8))   # >= 2 steps, capped at 2048 rows


@functools.partial(jax.jit, static_argnames=("action_space",))
def _policy_forward_packed(x, packed, action_space):
    B, S = x.shape
    A = action_space
    TB = _choose_batch_tile(B)
    grid = (pl.cdiv(B, TB),)   # no jnp.pad: partial last tile handled by Pallas

    mean, value = pl.pallas_call(
        policy_kernel,
        out_shape=(jax.ShapeDtypeStruct((B, A), jnp.float32),
                   jax.ShapeDtypeStruct((B, 1), jnp.float32)),
        grid=grid,
        in_specs=[
            pl.BlockSpec((TB, S), lambda i: (i, 0)),                 # x tile
            pl.BlockSpec((S, FUSED_H), lambda i: (0, 0)),            # w1 (resident)
            pl.BlockSpec((1, FUSED_H), lambda i: (0, 0)),            # b1
            pl.BlockSpec((FUSED_H, FUSED_H), lambda i: (0, 0)),      # w2
            pl.BlockSpec((1, FUSED_H), lambda i: (0, 0)),            # b2
            pl.BlockSpec((FUSED_H, W3_LANES), lambda i: (0, 0)),     # w3
            pl.BlockSpec((1, W3_LANES), lambda i: (0, 0)),           # b3
        ],
        out_specs=(pl.BlockSpec((TB, A), lambda i: (i, 0)),          # action_mean
                   pl.BlockSpec((TB, 1), lambda i: (i, 0))),         # action_value
        compiler_params=pltpu.CompilerParams(
            dimension_semantics=("parallel",)),
    )(x, packed["w1"], packed["b1"], packed["w2"], packed["b2"],
      packed["w3"], packed["b3"])

    # sigma is input-independent: computed once here, not in the kernel.
    sigma = jax.nn.softplus(packed["sigma"])[0]
    return mean, sigma, value


def policy_forward(x, packed):
    """Returns (action_mean (B,A), sigma (A,), action_value (B,1)).
    (action_mean, sigma) parameterize the Normal distribution the PyTorch
    module returns."""
    return _policy_forward_packed(x, packed, action_space=packed["action_space"])


# ---------------------------------------------------------------- references
def policy_forward_ref_f32(x, p):
    """Pure-JAX f32 reference on the UNFUSED parameters (module semantics)."""
    ha = jnp.tanh(x @ p["w1a"] + p["b1a"])
    ha = jnp.tanh(ha @ p["w2a"] + p["b2a"])
    mean = ha @ p["w3a"] + p["b3a"]
    sigma = jax.nn.softplus(p["sigma"])[0]
    hc = jnp.tanh(x @ p["w1c"] + p["b1c"])
    hc = jnp.tanh(hc @ p["w2c"] + p["b2c"])
    value = hc @ p["w3c"] + p["b3c"]
    return mean, sigma, value


def policy_forward_ref_bf16(x, p):
    """Reference matching the kernel's numerics (bf16 operands, f32 accum)."""
    bf = jnp.bfloat16

    def lin(h, w, b):
        return jnp.dot(h.astype(bf), w.astype(bf),
                       preferred_element_type=jnp.float32) + b

    ha = jnp.tanh(lin(x, p["w1a"], p["b1a"]))
    ha = jnp.tanh(lin(ha, p["w2a"], p["b2a"]))
    mean = lin(ha, p["w3a"], p["b3a"])
    hc = jnp.tanh(lin(x, p["w1c"], p["b1c"]))
    hc = jnp.tanh(lin(hc, p["w2c"], p["b2c"]))
    value = lin(hc, p["w3c"], p["b3c"])
    sigma = jax.nn.softplus(p["sigma"])[0]
    return mean, sigma, value


if __name__ == "__main__":
    # Small shapes consistent with the module: state_space=8, action_space=3,
    # hidden=64 (fixed by the module), batch=4.
    state_space, action_space, batch = 8, 3, 4

    key = jax.random.PRNGKey(0)
    k_param, k_x, k_x2 = jax.random.split(key, 3)
    params = init_policy_params(k_param, state_space, action_space)
    packed = pack_policy_params(params)

    x = jax.random.normal(k_x, (batch, state_space), jnp.float32)
    mean, sigma, value = policy_forward(x, packed)
    jax.block_until_ready((mean, sigma, value))

    assert mean.shape == (batch, action_space)
    assert value.shape == (batch, 1)

    # Tight check against a numerics-matched (bf16 operand) reference.
    mean_r, sigma_r, value_r = policy_forward_ref_bf16(x, params)
    assert jnp.allclose(sigma, sigma_r, atol=1e-6, rtol=1e-6)
    assert jnp.allclose(mean, mean_r, atol=2e-2, rtol=2e-2)
    assert jnp.allclose(value, value_r, atol=2e-2, rtol=2e-2)

    # Loose sanity check against the full-f32 module semantics.
    mean_f, _, value_f = policy_forward_ref_f32(x, params)
    assert jnp.allclose(mean, mean_f, atol=0.5, rtol=0.1)
    assert jnp.allclose(value, value_f, atol=0.5, rtol=0.1)

    # Larger batch: exercises multi-step grid + partial last tile (no padding).
    big_b = 2500
    xb = jax.random.normal(k_x2, (big_b, state_space), jnp.float32)
    mean_b, _, value_b = policy_forward(xb, packed)
    jax.block_until_ready((mean_b, value_b))
    mean_br, _, value_br = policy_forward_ref_bf16(xb, params)
    assert mean_b.shape == (big_b, action_space)
    assert value_b.shape == (big_b, 1)
    assert jnp.allclose(mean_b, mean_br, atol=3e-2, rtol=3e-2)
    assert jnp.allclose(value_b, value_br, atol=3e-2, rtol=3e-2)

    print("KERNEL_OK")
</pallas_src>

<mosaic_0001>
module attributes {stable_mosaic.version = 11 : i64} {
  func.func @policy_kernel(%arg0: i32, %arg1: memref<8x8xf32, #tpu.memory_space<vmem>>, %arg2: memref<8x128xbf16, #tpu.memory_space<vmem>>, %arg3: memref<1x128xf32, #tpu.memory_space<vmem>>, %arg4: memref<128x128xbf16, #tpu.memory_space<vmem>>, %arg5: memref<1x128xf32, #tpu.memory_space<vmem>>, %arg6: memref<128x128xbf16, #tpu.memory_space<vmem>>, %arg7: memref<1x128xf32, #tpu.memory_space<vmem>>, %arg8: memref<8x3xf32, #tpu.memory_space<vmem>>, %arg9: memref<8x1xf32, #tpu.memory_space<vmem>>) attributes {dimension_semantics = [#tpu.dimension_semantics<parallel>], iteration_bounds = array<i64: 1>, scalar_prefetch = 0 : i64, scratch_operands = 0 : i64, tpu.core_type = #tpu.core_type<tc>, window_params = [{transform_indices = @transform_0, window_bounds = array<i64: 8, 8>}, {pipeline_mode = #tpu.pipeline_mode<synchronous>, transform_indices = @transform_1, window_bounds = array<i64: 8, 128>}, {pipeline_mode = #tpu.pipeline_mode<synchronous>, transform_indices = @transform_2, window_bounds = array<i64: 1, 128>}, {pipeline_mode = #tpu.pipeline_mode<synchronous>, transform_indices = @transform_3, window_bounds = array<i64: 128, 128>}, {pipeline_mode = #tpu.pipeline_mode<synchronous>, transform_indices = @transform_4, window_bounds = array<i64: 1, 128>}, {pipeline_mode = #tpu.pipeline_mode<synchronous>, transform_indices = @transform_5, window_bounds = array<i64: 128, 128>}, {pipeline_mode = #tpu.pipeline_mode<synchronous>, transform_indices = @transform_6, window_bounds = array<i64: 1, 128>}, {transform_indices = @transform_7, window_bounds = array<i64: 8, 3>}, {transform_indices = @transform_8, window_bounds = array<i64: 8, 1>}]} {
    %c0 = arith.constant 0 : index
    %c0_0 = arith.constant 0 : index
    %0 = vector.load %arg1[%c0, %c0_0] : memref<8x8xf32, #tpu.memory_space<vmem>>, vector<8x8xf32>
    %1 = arith.truncf %0 : vector<8x8xf32> to vector<8x8xbf16>
    %c0_1 = arith.constant 0 : index
    %c0_2 = arith.constant 0 : index
    %2 = vector.load %arg2[%c0_1, %c0_2] : memref<8x128xbf16, #tpu.memory_space<vmem>>, vector<8x128xbf16>
    %cst = arith.constant dense<0.000000e+00> : vector<8x128xf32>
    %3 = tpu.matmul %1, %2, %cst {dimension_numbers = #tpu.dot_dimension_numbers<[1], [0], [0], [1], [0, 0, 1, 1], [], []>} : vector<8x8xbf16>, vector<8x128xbf16>, vector<8x128xf32> -> vector<8x128xf32>
    %c0_3 = arith.constant 0 : index
    %c0_4 = arith.constant 0 : index
    %4 = vector.load %arg3[%c0_3, %c0_4] : memref<1x128xf32, #tpu.memory_space<vmem>>, vector<1x128xf32>
    %5 = vector.broadcast %4 : vector<1x128xf32> to vector<8x128xf32>
    %6 = arith.addf %3, %5 : vector<8x128xf32>
    %7 = math.tanh %6 : vector<8x128xf32>
    %8 = arith.truncf %7 : vector<8x128xf32> to vector<8x128xbf16>
    %c0_5 = arith.constant 0 : index
    %c0_6 = arith.constant 0 : index
    %9 = vector.load %arg4[%c0_5, %c0_6] : memref<128x128xbf16, #tpu.memory_space<vmem>>, vector<128x128xbf16>
    %cst_7 = arith.constant dense<0.000000e+00> : vector<8x128xf32>
    %10 = tpu.matmul %8, %9, %cst_7 {dimension_numbers = #tpu.dot_dimension_numbers<[1], [0], [0], [1], [0, 0, 1, 1], [], []>} : vector<8x128xbf16>, vector<128x128xbf16>, vector<8x128xf32> -> vector<8x128xf32>
    %c0_8 = arith.constant 0 : index
    %c0_9 = arith.constant 0 : index
    %11 = vector.load %arg5[%c0_8, %c0_9] : memref<1x128xf32, #tpu.memory_space<vmem>>, vector<1x128xf32>
    %12 = vector.broadcast %11 : vector<1x128xf32> to vector<8x128xf32>
    %13 = arith.addf %10, %12 : vector<8x128xf32>
    %14 = math.tanh %13 : vector<8x128xf32>
    %15 = arith.truncf %14 : vector<8x128xf32> to vector<8x128xbf16>
    %c0_10 = arith.constant 0 : index
    %c0_11 = arith.constant 0 : index
    %16 = vector.load %arg6[%c0_10, %c0_11] : memref<128x128xbf16, #tpu.memory_space<vmem>>, vector<128x128xbf16>
    %cst_12 = arith.constant dense<0.000000e+00> : vector<8x128xf32>
    %17 = tpu.matmul %15, %16, %cst_12 {dimension_numbers = #tpu.dot_dimension_numbers<[1], [0], [0], [1], [0, 0, 1, 1], [], []>} : vector<8x128xbf16>, vector<128x128xbf16>, vector<8x128xf32> -> vector<8x128xf32>
    %c0_13 = arith.constant 0 : index
    %c0_14 = arith.constant 0 : index
    %18 = vector.load %arg7[%c0_13, %c0_14] : memref<1x128xf32, #tpu.memory_space<vmem>>, vector<1x128xf32>
    %19 = vector.broadcast %18 : vector<1x128xf32> to vector<8x128xf32>
    %20 = arith.addf %17, %19 : vector<8x128xf32>
    %21 = vector.extract_strided_slice %20 {offsets = [0, 0], sizes = [8, 3], strides = [1, 1]} : vector<8x128xf32> to vector<8x3xf32>
    %c0_15 = arith.constant 0 : index
    %c0_16 = arith.constant 0 : index
    %22 = vector.load %arg8[%c0_15, %c0_16] : memref<8x3xf32, #tpu.memory_space<vmem>>, vector<8x3xf32>
    tpu.vector_store %arg8[%c0_15, %c0_16], %21 {strides = array<i32>} : memref<8x3xf32, #tpu.memory_space<vmem>>, vector<8x3xf32>,
    %23 = vector.extract_strided_slice %20 {offsets = [0, 3], sizes = [8, 1], strides = [1, 1]} : vector<8x128xf32> to vector<8x1xf32>
    %c0_17 = arith.constant 0 : index
    %c0_18 = arith.constant 0 : index
    %24 = vector.load %arg9[%c0_17, %c0_18] : memref<8x1xf32, #tpu.memory_space<vmem>>, vector<8x1xf32>
    tpu.vector_store %arg9[%c0_17, %c0_18], %23 {strides = array<i32>} : memref<8x1xf32, #tpu.memory_space<vmem>>, vector<8x1xf32>,
    return
  }
  func.func @transform_0(%arg0: i32) -> (i32, i32) {
    %c0_i32 = arith.constant 0 : i32
    %c0_i32_0 = arith.constant 0 : i32
    return %arg0, %c0_i32 : i32, i32
  }
  func.func @transform_1(%arg0: i32) -> (i32, i32) {
    %c0_i32 = arith.constant 0 : i32
    %c0_i32_0 = arith.constant 0 : i32
    %c0_i32_1 = arith.constant 0 : i32
    return %c0_i32, %c0_i32_0 : i32, i32
  }
  func.func @transform_2(%arg0: i32) -> (i32, i32) {
    %c0_i32 = arith.constant 0 : i32
    %c0_i32_0 = arith.constant 0 : i32
    %c0_i32_1 = arith.constant 0 : i32
    return %c0_i32, %c0_i32_0 : i32, i32
  }
  func.func @transform_3(%arg0: i32) -> (i32, i32) {
    %c0_i32 = arith.constant 0 : i32
    %c0_i32_0 = arith.constant 0 : i32
    %c0_i32_1 = arith.constant 0 : i32
    return %c0_i32, %c0_i32_0 : i32, i32
  }
  func.func @transform_4(%arg0: i32) -> (i32, i32) {
    %c0_i32 = arith.constant 0 : i32
    %c0_i32_0 = arith.constant 0 : i32
    %c0_i32_1 = arith.constant 0 : i32
    return %c0_i32, %c0_i32_0 : i32, i32
  }
  func.func @transform_5(%arg0: i32) -> (i32, i32) {
    %c0_i32 = arith.constant 0 : i32
    %c0_i32_0 = arith.constant 0 : i32
    %c0_i32_1 = arith.constant 0 : i32
    return %c0_i32, %c0_i32_0 : i32, i32
  }
  func.func @transform_6(%arg0: i32) -> (i32, i32) {
    %c0_i32 = arith.constant 0 : i32
    %c0_i32_0 = arith.constant 0 : i32
    %c0_i32_1 = arith.constant 0 : i32
    return %c0_i32, %c0_i32_0 : i32, i32
  }
  func.func @transform_7(%arg0: i32) -> (i32, i32) {
    %c0_i32 = arith.constant 0 : i32
    %c0_i32_0 = arith.constant 0 : i32
    return %arg0, %c0_i32 : i32, i32
  }
  func.func @transform_8(%arg0: i32) -> (i32, i32) {
    %c0_i32 = arith.constant 0 : i32
    %c0_i32_0 = arith.constant 0 : i32
    return %arg0, %c0_i32 : i32, i32
  }
}

</mosaic_0001>

<bundles_post_ra>
// kernel: _policy_forward_packed.1
= control target key start
LH: loop header
LB: loop body
LE: loop exit
PB: predicated region body
PF: predicated region fallthrough
CT: control target
= control target key end

     0   :  { %14 = vsyncpa [#allocation3], 0  ;;  %s789_s0 = inlined_call_operand.hbm [shape: f32[4,8], index: 0, kind: input, shape index: {}]   ;;  %s790_s1 = inlined_call_operand.vmem [shape: bf16[8,128], index: 1, kind: input, shape index: {}]   ;;  %s791_s2 = inlined_call_operand.vmem [shape: f32[1,128], index: 2, kind: input, shape index: {}]   ;;  %s792_s3 = inlined_call_operand.hbm [shape: bf16[128,128], index: 3, kind: input, shape index: {}]   ;;  %s793_s4 = inlined_call_operand.vmem [shape: f32[1,128], index: 4, kind: input, shape index: {}]   ;;  %s794_s5 = inlined_call_operand.hbm [shape: bf16[128,128], index: 5, kind: input, shape index: {}]   ;;  %s795_s6 = inlined_call_operand.vmem [shape: f32[1,128], index: 6, kind: input, shape index: {}]   ;;  %s796_s7 = inlined_call_operand.hbm [shape: f32[4,3], index: 7, kind: output, shape index: {0}]   ;;  %s797_s8 = inlined_call_operand.vmem [shape: f32[4,1], index: 8, kind: output, shape index: {1}]  }
   0x1   :  { %15 = vsyncpa [#allocation6], 0 }
   0x2   :  { %16 = vsyncpa [#allocation4], 0 }
   0x3   :  { %21 = vsyncadd [#allocation3], 64  ;;  %s629_s27 = smov [#allocation5]   ;;  %s630_s29 = smov [#allocation2]  }
   0x4   :  { %s38_s28 = sshll.u32 %s629_s27, 4  ;;  %s22_s30 = sshll.u32 %s630_s29, 4  ;;  %s39_s28 = int_to_ptr.vmem [resolvable:$true] %s38_s28  ;;  %s683_s30 = int_to_ptr.vmem [resolvable:$true] %s22_s30 }
   0x5   :  { %s535_s11 = scalar_lea.hbm %s792_s3, 1024 }
   0x6   :  { %p536_p0 = scmp.ne.s32.totalorder %s792_s3, %s535_s11  ;;  %p539_p1 = scmp.lt.u32.totalorder %s535_s11, %s792_s3 }
   0x8   :  { %p541_p2 = pnand %p539_p1, %p536_p0 }
   0xa   :  { %544 = shalt.err (!%p541_p2)
}
   0xb   :  { %s545_s16 = scalar_lea.vmem %s39_s28, 1024  ;;  %p550_p4 = scmp.lt.s32.totalorder %s39_s28, %s39_s28 }
   0xc   :  { %p546_p3 = scmp.ne.s32.totalorder %s39_s28, %s545_s16  ;;  %p551_p5 = scmp.lt.s32.totalorder %s545_s16, %s545_s16 }
   0xe   :  { %p552_p6 = por %p551_p5, %p550_p4 }
  0x10   :  { %p553_p7 = pnand %p552_p6, %p546_p3 }
  0x12   :  { %556 = shalt.err (!%p553_p7)
}
  0x13   :  { %s631_s17 = smov 64   ;;  %s632_s18 = smov 4  }
  0x14   :  { %44 = dma.hbm_to_vmem [thread:$0]  %s792_s3, 1024, %s39_s28, [#allocation6], %s631_s17, %s631_s17, %s632_s18  }
  0x15   :  { %s557_s23 = scalar_lea.hbm %s789_s0, 64 }
  0x16   :  { %p558_p8 = scmp.ne.s32.totalorder %s789_s0, %s557_s23  ;;  %p561_p9 = scmp.lt.u32.totalorder %s557_s23, %s789_s0 }
  0x18   :  { %p563_p10 = pnand %p561_p9, %p558_p8 }
  0x1a   :  { %566 = shalt.err (!%p563_p10)
}
  0x1b   :  { %s567_s29 = scalar_lea.vmem %s683_s30, 64  ;;  %s571_s3 = scalar_lea.vmem %s683_s30, 128 }
  0x1c   :  { %p568_p11 = scmp.ne.s32.totalorder %s683_s30, %s567_s29  ;;  %p572_p12 = scmp.lt.s32.totalorder %s683_s30, %s683_s30 }
  0x1d   :  { %p573_p13 = scmp.lt.s32.totalorder %s571_s3, %s567_s29 }
  0x1f   :  { %p574_p0 = por %p573_p13, %p572_p12 }
  0x21   :  { %p575_p1 = pnand %p574_p0, %p568_p11 }
  0x23   :  { %578 = shalt.err (!%p575_p1)
}
  0x24   :  { %28 = dma.hbm_to_vmem [thread:$0]  %s789_s0, 64, %s683_s30, [#allocation3], %s631_s17, %s631_s17, %s632_s18  }
  0x25   :  { %s633_s10 = smov [#allocation7]   ;;  %s579_s14 = scalar_lea.hbm %s794_s5, 1024 }
  0x26   :  { %s52_s11 = sshll.u32 %s633_s10, 4  ;;  %p580_p2 = scmp.ne.s32.totalorder %s794_s5, %s579_s14  ;;  %s53_s11 = int_to_ptr.vmem [resolvable:$true] %s52_s11 }
  0x27   :  { %p583_p3 = scmp.lt.u32.totalorder %s579_s14, %s794_s5 }
  0x29   :  { %p585_p4 = pnand %p583_p3, %p580_p2 }
  0x2b   :  { %588 = shalt.err (!%p585_p4)
}
  0x2c   :  { %s589_s21 = scalar_lea.vmem %s53_s11, 1024  ;;  %p594_p6 = scmp.lt.s32.totalorder %s53_s11, %s53_s11 }
  0x2d   :  { %p590_p5 = scmp.ne.s32.totalorder %s53_s11, %s589_s21  ;;  %p595_p7 = scmp.lt.s32.totalorder %s589_s21, %s589_s21 }
  0x2f   :  { %p596_p8 = por %p595_p7, %p594_p6 }
  0x31   :  { %p597_p9 = pnand %p596_p8, %p590_p5 }
  0x33   :  { %600 = shalt.err (!%p597_p9)
}
  0x34   :  { %58 = dma.hbm_to_vmem [thread:$0]  %s794_s5, 1024, %s53_s11, [#allocation6], %s631_s17, %s631_s17, %s632_s18  }
  0x35   :  { %623 = dma.done.wait [#allocation3], 128  }
  0x36   :  { %624 = vsyncadd [#allocation3], 4294967168 }
  0x37   :  { %625 = dma.done.wait [#allocation6], 2048  }
  0x38   :  { %626 = vsyncadd [#allocation6], 4294965248  ;;  %v634_v0 = vmov 0.0   ;;  %vm635_vm0 = vmmov 0   ;;  %vm85_vm1 = vcmask 1043456   ;;  %v71_v2 = vld [vmem:[#allocation2] sm:$0xff] }
  0x39   :  { %460 = vmatprep.subr.bf16.mxu0 %v634_v0  ;;  %462 = vmatprep.mubr.msk.bf16.mxu0 %vm635_vm0, %v634_v0  ;;  %v73_v1 = vld [vmem:[%s790_s1] sm:$0xf]  ;;  %v72_v4 = vpack.c.bf16 %v71_v2, %v71_v2  ;;  %v515_v5 = vld [vmem:[#allocation5] sm:$0xff]   ;;  %vm81_vm2 = vcmask 64512   ;;  %v516_v6 = vld [vmem:[#allocation5 + $0x8] sm:$0xff]   ;;  %vm355_vm3 = vcmask 23552  }
  0x3a   :  { %466 = vmatprep.subr.bf16.mxu1 %v634_v0  ;;  %482 = vmatprep.mubr.msk.bf16.mxu1 %vm635_vm0, %v634_v0  ;;  %v87_v3 = vsel %vm85_vm1, %v73_v1, 0  ;;  %v517_v7 = vld [vmem:[#allocation5 + $0x10] sm:$0xff]   ;;  %v518_v8 = vld [vmem:[#allocation5 + $0x18] sm:$0xff]   ;;  %v519_v9 = vld [vmem:[#allocation5 + $0x20] sm:$0xff]   ;;  %vm361_vm4 = vcmask 7168  }
  0x3b   :  { %461 = vmatpush3.bf16.msra.mxu0 %v87_v3  ;;  %467 = vmatpush3.bf16.msra.mxu1 %v515_v5  ;;  %v520_v10 = vld [vmem:[#allocation5 + $0x28] sm:$0xff]   ;;  %v521_v11 = vld [vmem:[#allocation5 + $0x30] sm:$0xff]   ;;  %v522_v12 = vld [vmem:[#allocation5 + $0x38] sm:$0xff]  }
  0x3c   :  { %486 = vmatprep.subr.bf16.mxu0 %v634_v0  ;;  %468 = vmatprep.subr.bf16.mxu1 %v634_v0  ;;  %v523_v13 = vld [vmem:[#allocation7] sm:$0xff]   ;;  %v524_v14 = vld [vmem:[#allocation7 + $0x8] sm:$0xff]   ;;  %v525_v15 = vld [vmem:[#allocation7 + $0x10] sm:$0xff]  }
  0x3d   :  { %v526_v16 = vld [vmem:[#allocation7 + $0x18] sm:$0xff]   ;;  %v527_v25 = vld [vmem:[#allocation7 + $0x20] sm:$0xff]   ;;  %v528_v26 = vld [vmem:[#allocation7 + $0x28] sm:$0xff]  }
  0x3e   :  { %463 = vmatmul.mubr.msk.bf16.vlgmr.msra.gmra.mrb[0].mxu0 %vm81_vm2, %v72_v4  ;;  %v420_v17 = vld [vmem:[%s791_s2] ss:$0 sm:$0xff]  ;;  %v529_v27 = vld [vmem:[#allocation7 + $0x30] sm:$0xff]  }
  0x3f   :  { %502 = vmatprep.mubr.msk.bf16.mxu0 %vm635_vm0, %v634_v0  ;;  %469 = vmatpush3.bf16.msra.mxu1 %v516_v6  ;;  %v530_v28 = vld [vmem:[#allocation7 + $0x38] sm:$0xff]  }
  0x40   :  { %470 = vmatprep.subr.bf16.mxu1 %v634_v0  ;;  %487 = vmatpush3.bf16.msra.mxu0 %v523_v13  ;;  %v422_v29 = vld [vmem:[%s793_s4] ss:$0 sm:$0xff]  ;;  %s636_s4 = smov 125  }
  0x41   :  { %488 = vmatprep.subr.bf16.mxu0 %v634_v0  ;;  %v431_v37 = vld [vmem:[%s795_s6] ss:$0 sm:$0xff] }
  0x43   :  { %471 = vmatpush3.bf16.msra.mxu1 %v517_v7 }
  0x44   :  { %472 = vmatprep.subr.bf16.mxu1 %v634_v0  ;;  %489 = vmatpush3.bf16.msra.mxu0 %v524_v14 }
  0x45   :  { %490 = vmatprep.subr.bf16.mxu0 %v634_v0 }
  0x47   :  { %473 = vmatpush3.bf16.msra.mxu1 %v518_v8 }
  0x48   :  { %474 = vmatprep.subr.bf16.mxu1 %v634_v0  ;;  %491 = vmatpush3.bf16.msra.mxu0 %v525_v15 }
  0x49   :  { %492 = vmatprep.subr.bf16.mxu0 %v634_v0 }
  0x4b   :  { %475 = vmatpush3.bf16.msra.mxu1 %v519_v9 }
  0x4c   :  { %476 = vmatprep.subr.bf16.mxu1 %v634_v0  ;;  %493 = vmatpush3.bf16.msra.mxu0 %v526_v16 }
  0x4d   :  { %494 = vmatprep.subr.bf16.mxu0 %v634_v0 }
  0x4f   :  { %477 = vmatpush3.bf16.msra.mxu1 %v520_v10 }
  0x50   :  { %478 = vmatprep.subr.bf16.mxu1 %v634_v0  ;;  %495 = vmatpush3.bf16.msra.mxu0 %v527_v25 }
  0x51   :  { %496 = vmatprep.subr.bf16.mxu0 %v634_v0 }
  0x53   :  { %479 = vmatpush3.bf16.msra.mxu1 %v521_v11 }
  0x54   :  { %480 = vmatprep.subr.bf16.mxu1 %v634_v0  ;;  %497 = vmatpush3.bf16.msra.mxu0 %v528_v26 }
  0x55   :  { %498 = vmatprep.subr.bf16.mxu0 %v634_v0 }
  0x57   :  { %481 = vmatpush3.bf16.msra.mxu1 %v522_v12 }
  0x58   :  { %499 = vmatpush3.bf16.msra.mxu0 %v529_v27 }
  0x59   :  { %500 = vmatprep.subr.bf16.mxu0 %v634_v0 }
  0x5c   :  { %501 = vmatpush3.bf16.msra.mxu0 %v530_v28 }
 0x111   :  { %v123_v18 = vpop.f32.mrb[0].mxu0 }
 0x112   :  { %v124_v19 = vadd.f32 %v420_v17, %v123_v18  ;;  %v464_v20 = vpop.f32.mrb[1].mxu0 }
 0x113   :  { %v126_v21 = vpop.f32.mrb[2].mxu0 }
 0x114   :  { %531 = vtanh.f32 %v124_v19  ;;  %v465_v22 = vpop.f32.mrb[3].mxu0 }
 0x11e   :  { %v532_v23 = vpop.eup %531 }
 0x11f   :  { %v130_v24 = vpack.c.bf16 %v532_v23, %v532_v23 }
 0x121   :  { %483 = vmatmul.mubr.bf16.vlgmr.msra.gmra.mrb[0].mxu1 %v130_v24 }
 0x1f4   :  { %v236_v30 = vpop.f32.mrb[0].mxu1 }
 0x1f5   :  { %v237_v31 = vadd.f32 %v422_v29, %v236_v30  ;;  %v484_v32 = vpop.f32.mrb[1].mxu1 }
 0x1f6   :  { %v239_v33 = vpop.f32.mrb[2].mxu1 }
 0x1f7   :  { %533 = vtanh.f32 %v237_v31  ;;  %v485_v34 = vpop.f32.mrb[3].mxu1 }
 0x201   :  { %v534_v35 = vpop.eup %533 }
 0x202   :  { %v243_v36 = vpack.c.bf16 %v534_v35, %v534_v35 }
 0x204   :  { %503 = vmatmul.mubr.bf16.vlgmr.msra.gmra.mrb[4].mxu0 %v243_v36 }
 0x2d7   :  { %v349_v38 = vpop.f32.mrb[4].mxu0 }
 0x2d8   :  { %v350_v39 = vadd.f32 %v431_v37, %v349_v38  ;;  %v504_v40 = vpop.f32.mrb[5].mxu0 }
 0x2d9   :  { %v352_v41 = vpop.f32.mrb[6].mxu0 }
 0x2da   :  { %356 = vst.msk [vmem:[#allocation8] sm:$0xff] %vm355_vm3, %v350_v39  ;;  %v505_v42 = vpop.f32.mrb[7].mxu0  ;;  %358 = vrot.lane.b32.xlu0 %v350_v39, %s636_s4 }
 0x34c   :  { %v359_v43 = vpop.permute.xlu0 %358 }
 0x34d   :  { %362 = vst.msk [vmem:[#allocation9] sm:$0xff] %vm361_vm4, %v359_v43 }
 0x34e   :  { %367 = vsyncadd [#allocation4], 64  ;;  %s637_s27 = smov [#allocation8]  }
 0x34f   :  { %s368_s29 = sshll.u32 %s637_s27, 4  ;;  %s369_s29 = int_to_ptr.vmem [resolvable:$true] %s368_s29 }
 0x350   :  { %s601_s6 = scalar_lea.vmem %s369_s29, 64  ;;  %s605_s9 = scalar_lea.vmem %s369_s29, 128 }
 0x351   :  { %p602_p10 = scmp.ne.s32.totalorder %s369_s29, %s601_s6  ;;  %p606_p11 = scmp.lt.s32.totalorder %s369_s29, %s369_s29 }
 0x352   :  { %p607_p12 = scmp.lt.s32.totalorder %s605_s9, %s601_s6 }
 0x354   :  { %v392_v44 = vld [vmem:[#allocation9] sm:$0xf]  ;;  %p608_p13 = por %p607_p12, %p606_p11 }
 0x355   :  { %393 = vst [vmem:[%s797_s8] sm:$0xf] %v392_v44 }
 0x356   :  { %p609_p0 = pnand %p608_p13, %p602_p10 }
 0x358   :  { %612 = shalt.err (!%p609_p0)
}
 0x359   :  { %s613_s12 = scalar_lea.hbm %s796_s7, 64 }
 0x35a   :  { %p614_p1 = scmp.ne.s32.totalorder %s796_s7, %s613_s12  ;;  %p617_p2 = scmp.lt.u32.totalorder %s613_s12, %s796_s7 }
 0x35c   :  { %p619_p3 = pnand %p617_p2, %p614_p1 }
 0x35e   :  { %622 = shalt.err (!%p619_p3)
}
 0x35f   :  { %374 = dma.vmem_to_hbm [thread:$0]  %s369_s29, 64, %s796_s7, [#allocation4], %s631_s17, %s631_s17, %s632_s18  }
 0x360   :  { %627 = dma.done.wait [#allocation4], 128  }
 0x361   :  { %628 = vsyncadd [#allocation4], 4294967168 }
 0x362   :  { %413 = vsyncpa [#allocation3], 1 }
 0x363   :  { %414 = vsyncpa [#allocation6], 1 }
 0x364   :  { %415 = vsyncpa [#allocation4], 1 }

</bundles_post_ra>
